<compile_context>
chip_gen: v7x
topology: tpu7x:2x2x1
jax: 0.10.0
libtpu: 0.0.40
codegen_flags: <defaults>
</compile_context>

<pallas_src>
import functools
import math

import jax
import jax.numpy as jnp
from jax.experimental import pallas as pl
from jax.experimental.pallas import tpu as pltpu


# ---------------------------------------------------------------------------
# Tiling helpers
# ---------------------------------------------------------------------------

def _vmem_limit_bytes() -> int:
    """Scoped-VMEM request derived from the chip's physical VMEM capacity."""
    cap = 64 * 1024 * 1024                      # conservative fallback (v7x)
    try:
        cap = int(getattr(pltpu.get_tpu_info(), "vmem_capacity_bytes", cap))
    except Exception:
        pass
    # ~48 MiB on v7x (64 MiB phys), capped ~96-100 MiB on v5e/v6e (128 MiB).
    return min(cap * 3 // 4, 100 * 1024 * 1024)


def _pick_tile(s: int, max_tile: int, align: int = 8) -> int:
    """Largest divisor of `s` that is <= max_tile and a multiple of `align`;
    the whole axis if s itself fits (a full-extent block is always legal)."""
    if s <= max_tile:
        return s
    for d in range(min(max_tile, s), align - 1, -1):
        if s % d == 0 and d % align == 0:
            return d
    # TODO(synk): pad ragged sequence lengths instead of whole-axis fallback.
    return s


def _pick_head_group(n_head: int, head_size: int, max_group_width: int = 512) -> int:
    """Heads per group: smallest group whose lane width (heads*head_size) is a
    multiple of 128 (legal lane-dim BlockSpec slice) and <= max_group_width;
    otherwise all heads (width == n_embd; full extent is always legal)."""
    for hpg in range(1, n_head + 1):
        if n_head % hpg:
            continue
        width = hpg * head_size
        if width % 128 == 0 and width <= max_group_width:
            return hpg
    return n_head


def _pick_q_tile(sq: int, sk: int, heads_per_group: int, need_weights: bool,
                 attn_bytes: int, vmem_budget: int, q_tile_cap: int) -> int:
    """q-tile sized so the f32 score/prob working set plus the (double
    buffered) attention-weights block stays well inside the VMEM budget."""
    per_row = heads_per_group * sk * (8 + (2 * attn_bytes if need_weights else 0))
    cap = int((vmem_budget // 2) // max(per_row, 1))
    cap = max(8, min(cap, q_tile_cap))
    return _pick_tile(sq, cap)


# ---------------------------------------------------------------------------
# Tiled linear kernel:  out = x @ w_t + b   (used for all four projections)
# ---------------------------------------------------------------------------

def _linear_kernel(x_ref, w_ref, b_ref, o_ref):
    y = jnp.dot(x_ref[0], w_ref[...], preferred_element_type=jnp.float32)
    o_ref[0] = (y + b_ref[...]).astype(o_ref.dtype)


def _linear(x, w_t, b, *, out_dtype, seq_tile, vmem_limit):
    """x: (B, S, E_in); w_t: (E_in, E_out); b: (1, E_out) f32."""
    B, S, E_in = x.shape
    E_out = w_t.shape[1]
    ts = _pick_tile(S, seq_tile)
    return pl.pallas_call(
        _linear_kernel,
        out_shape=jax.ShapeDtypeStruct((B, S, E_out), out_dtype),
        grid=(B, S // ts),
        in_specs=[
            pl.BlockSpec((1, ts, E_in), lambda bi, si: (bi, si, 0)),
            pl.BlockSpec((E_in, E_out), lambda bi, si: (0, 0)),
            pl.BlockSpec((1, E_out), lambda bi, si: (0, 0)),
        ],
        out_specs=pl.BlockSpec((1, ts, E_out), lambda bi, si: (bi, si, 0)),
        compiler_params=pltpu.CompilerParams(
            dimension_semantics=("parallel", "parallel"),
            vmem_limit_bytes=vmem_limit),
    )(x, w_t, b)


# ---------------------------------------------------------------------------
# Attention kernel over a (batch, head-group, q-tile) grid
# ---------------------------------------------------------------------------

def _attn_kernel(q_ref, k_ref, v_ref, *out_refs,
                 heads_per_group: int, head_size: int, compute_dtype):
    ctx_ref = out_refs[0]
    attn_ref = out_refs[1] if len(out_refs) > 1 else None

    tq = q_ref.shape[1]
    sk = k_ref.shape[1]
    hg, hd = heads_per_group, head_size

    q = q_ref[0].reshape(tq, hg, hd)     # 1/sqrt(hd) already folded into Wq/bq
    k = k_ref[0].reshape(sk, hg, hd)
    v = v_ref[0].reshape(sk, hg, hd)

    # scores: (hg, tq, sk) with f32 accumulation on the MXU.
    s = jnp.einsum("qhd,khd->hqk", q, k, preferred_element_type=jnp.float32)

    # numerically-stable softmax over keys, f32 on every chip generation.
    s = s - jnp.max(s, axis=-1, keepdims=True)
    e = jnp.exp(s)
    inv = 1.0 / jnp.sum(e, axis=-1, keepdims=True)   # tiny (hg, tq, 1) tensor
    p = e * inv                                       # rows sum to 1 (exact)

    if attn_ref is not None:
        attn_ref[0] = p.astype(attn_ref.dtype)

    ctx = jnp.einsum("hqk,khd->qhd", p.astype(compute_dtype), v,
                     preferred_element_type=jnp.float32)
    ctx_ref[0] = ctx.reshape(tq, hg * hd).astype(ctx_ref.dtype)


# ---------------------------------------------------------------------------
# Parameter prep (one-time) and the public forward wrapper
# ---------------------------------------------------------------------------

def prepare_params(params, *, n_head: int, compute_dtype=jnp.bfloat16):
    """One-time parameter prep (call once, outside the per-step path):
    transpose torch-convention (out,in) weights to (in,out), cast MXU inputs
    to compute_dtype, keep biases f32, and fold the 1/sqrt(head_size) softmax
    scale into the Q projection."""
    E = params["wq"].shape[0]
    scale = 1.0 / math.sqrt(E // n_head)
    return {
        "wq_t": (params["wq"].T * scale).astype(compute_dtype),
        "bq":   (params["bq"] * scale).reshape(1, E).astype(jnp.float32),
        "wk_t": params["wk"].T.astype(compute_dtype),
        "bk":   params["bk"].reshape(1, E).astype(jnp.float32),
        "wv_t": params["wv"].T.astype(compute_dtype),
        "bv":   params["bv"].reshape(1, E).astype(jnp.float32),
        "wo_t": params["wo"].T.astype(compute_dtype),
        "bo":   params["bo"].reshape(1, E).astype(jnp.float32),
    }


def multi_head_attention(query, key, value, prepped, *, n_head: int,
                         need_weights: bool = True, attn_dtype=jnp.float32,
                         q_tile: int = 512):
    """query/key/value: (B, S, E).  prepped: output of prepare_params.
    Returns (output (B,Sq,E) in the input dtype,
             attn_weights (B,n_head,Sq,Sk) in attn_dtype, or None)."""
    B, Sq, E = query.shape
    _, Sk, _ = key.shape
    assert E % n_head == 0
    hd = E // n_head
    compute_dtype = prepped["wq_t"].dtype
    out_dtype = query.dtype
    vmem_limit = _vmem_limit_bytes()

    # --- projections: computed exactly once (hoisted out of the q-tile loop) --
    Qp = _linear(query.astype(compute_dtype), prepped["wq_t"], prepped["bq"],
                 out_dtype=compute_dtype, seq_tile=q_tile, vmem_limit=vmem_limit)
    Kp = _linear(key.astype(compute_dtype), prepped["wk_t"], prepped["bk"],
                 out_dtype=compute_dtype, seq_tile=q_tile, vmem_limit=vmem_limit)
    Vp = _linear(value.astype(compute_dtype), prepped["wv_t"], prepped["bv"],
                 out_dtype=compute_dtype, seq_tile=q_tile, vmem_limit=vmem_limit)

    # --- attention: grid over (batch, head group, q tile) ---------------------
    hpg = _pick_head_group(n_head, hd)
    n_groups = n_head // hpg
    gw = hpg * hd                                    # lane width of one group
    tq = _pick_q_tile(Sq, Sk, hpg, need_weights,
                      jnp.dtype(attn_dtype).itemsize, vmem_limit, q_tile)
    n_q = Sq // tq

    kernel = functools.partial(_attn_kernel, heads_per_group=hpg,
                               head_size=hd, compute_dtype=compute_dtype)

    ctx_shape = jax.ShapeDtypeStruct((B, Sq, E), compute_dtype)
    ctx_spec = pl.BlockSpec((1, tq, gw), lambda bi, g, i: (bi, i, g))
    if need_weights:
        out_shape = (ctx_shape,
                     jax.ShapeDtypeStruct((B, n_head, Sq, Sk), attn_dtype))
        out_specs = (ctx_spec,
                     pl.BlockSpec((1, hpg, tq, Sk), lambda bi, g, i: (bi, g, i, 0)))
    else:
        out_shape, out_specs = ctx_shape, ctx_spec

    res = pl.pallas_call(
        kernel,
        out_shape=out_shape,
        grid=(B, n_groups, n_q),
        in_specs=[
            pl.BlockSpec((1, tq, gw), lambda bi, g, i: (bi, i, g)),   # Q tile
            pl.BlockSpec((1, Sk, gw), lambda bi, g, i: (bi, 0, g)),   # K (group)
            pl.BlockSpec((1, Sk, gw), lambda bi, g, i: (bi, 0, g)),   # V (group)
        ],
        out_specs=out_specs,
        compiler_params=pltpu.CompilerParams(
            dimension_semantics=("parallel", "parallel", "parallel"),
            vmem_limit_bytes=vmem_limit),
    )(Qp, Kp, Vp)

    ctx, attn = (res if need_weights else (res, None))

    # --- output projection: emitted in the input dtype ------------------------
    out = _linear(ctx, prepped["wo_t"], prepped["bo"],
                  out_dtype=out_dtype, seq_tile=q_tile, vmem_limit=vmem_limit)
    return out, attn


# ---------------------------------------------------------------------------
# Pure-JAX reference (mirrors the PyTorch forward, eval mode) + param init
# ---------------------------------------------------------------------------

def _reference_mha(query, key, value, params, *, n_head: int):
    B, Sq, E = query.shape
    _, Sk, _ = key.shape
    hd = E // n_head
    lin = lambda x, w, b: x @ w.T + b
    Q = lin(query, params["wq"], params["bq"]).reshape(B, Sq, n_head, hd).transpose(0, 2, 1, 3)
    K = lin(key, params["wk"], params["bk"]).reshape(B, Sk, n_head, hd).transpose(0, 2, 1, 3)
    V = lin(value, params["wv"], params["bv"]).reshape(B, Sk, n_head, hd).transpose(0, 2, 1, 3)
    scores = jnp.einsum("bhqd,bhkd->bhqk", Q, K) / math.sqrt(hd)
    attn = jax.nn.softmax(scores, axis=-1)
    out = jnp.einsum("bhqk,bhkd->bhqd", attn, V)
    out = out.transpose(0, 2, 1, 3).reshape(B, Sq, E)
    out = lin(out, params["wo"], params["bo"])
    return out, attn


def _init_params(key, n_embd):
    """Deterministic torch-style Linear init: U(-1/sqrt(in), 1/sqrt(in))."""
    bound = 1.0 / math.sqrt(n_embd)
    names = ["wq", "bq", "wk", "bk", "wv", "bv", "wo", "bo"]
    keys = jax.random.split(key, len(names))
    params = {}
    for i, name in enumerate(names):
        shape = (n_embd, n_embd) if name.startswith("w") else (n_embd,)
        params[name] = jax.random.uniform(
            keys[i], shape, jnp.float32, minval=-bound, maxval=bound)
    return params


if __name__ == "__main__":
    B, S, E, H = 2, 8, 32, 4   # batch, seq, n_embd, n_head  (head_size = 8)

    root = jax.random.PRNGKey(0)
    kq, kk, kv, kp = jax.random.split(root, 4)
    query = jax.random.normal(kq, (B, S, E), jnp.float32)
    key = jax.random.normal(kk, (B, S, E), jnp.float32)
    value = jax.random.normal(kv, (B, S, E), jnp.float32)
    params = _init_params(kp, E)

    ref_out, ref_attn = _reference_mha(query, key, value, params, n_head=H)

    # f32 MXU path: tight check.
    prep_f32 = prepare_params(params, n_head=H, compute_dtype=jnp.float32)
    out, attn = multi_head_attention(query, key, value, prep_f32, n_head=H)
    jax.block_until_ready((out, attn))
    assert out.shape == (B, S, E) and attn.shape == (B, H, S, S)
    assert jnp.allclose(out, ref_out, atol=2e-3, rtol=2e-3)
    assert jnp.allclose(attn, ref_attn, atol=2e-3, rtol=2e-3)
    assert jnp.allclose(attn.sum(-1), 1.0, atol=1e-5)   # exact softmax denom

    # default bf16 MXU path (peak-rate on v5e/v6e/v7x): looser check.
    prep_bf16 = prepare_params(params, n_head=H)        # bf16 by default
    out_bf, attn_bf = multi_head_attention(query, key, value, prep_bf16, n_head=H)
    jax.block_until_ready((out_bf, attn_bf))
    assert jnp.allclose(out_bf, ref_out, atol=1e-1, rtol=1e-1)
    assert jnp.allclose(attn_bf, ref_attn, atol=5e-2, rtol=5e-2)

    # need_weights=False path: skips the (B,H,Sq,Sk) attention writeback.
    out_nw, attn_nw = multi_head_attention(query, key, value, prep_bf16,
                                           n_head=H, need_weights=False)
    jax.block_until_ready(out_nw)
    assert attn_nw is None
    assert jnp.allclose(out_nw, ref_out, atol=1e-1, rtol=1e-1)

    print("KERNEL_OK")
</pallas_src>

<mosaic_0001>
module attributes {stable_mosaic.version = 11 : i64} {
  func.func @_linear_kernel(%arg0: i32, %arg1: i32, %arg2: memref<1x8x32xf32, #tpu.memory_space<vmem>>, %arg3: memref<32x32xf32, #tpu.memory_space<vmem>>, %arg4: memref<1x32xf32, #tpu.memory_space<vmem>>, %arg5: memref<1x8x32xf32, #tpu.memory_space<vmem>>) attributes {dimension_semantics = [#tpu.dimension_semantics<parallel>, #tpu.dimension_semantics<parallel>], iteration_bounds = array<i64: 2, 1>, scalar_prefetch = 0 : i64, scratch_operands = 0 : i64, tpu.core_type = #tpu.core_type<tc>, window_params = [{transform_indices = @transform_0, window_bounds = array<i64: 1, 8, 32>}, {pipeline_mode = #tpu.pipeline_mode<synchronous>, transform_indices = @transform_1, window_bounds = array<i64: 32, 32>}, {pipeline_mode = #tpu.pipeline_mode<synchronous>, transform_indices = @transform_2, window_bounds = array<i64: 1, 32>}, {transform_indices = @transform_3, window_bounds = array<i64: 1, 8, 32>}]} {
    %c0 = arith.constant 0 : index
    %c0_0 = arith.constant 0 : index
    %c0_1 = arith.constant 0 : index
    %0 = vector.load %arg2[%c0, %c0_0, %c0_1] : memref<1x8x32xf32, #tpu.memory_space<vmem>>, vector<1x8x32xf32>
    %1 = vector.shape_cast %0 : vector<1x8x32xf32> to vector<8x32xf32>
    %c0_2 = arith.constant 0 : index
    %c0_3 = arith.constant 0 : index
    %2 = vector.load %arg3[%c0_2, %c0_3] : memref<32x32xf32, #tpu.memory_space<vmem>>, vector<32x32xf32>
    %cst = arith.constant dense<0.000000e+00> : vector<8x32xf32>
    %3 = tpu.matmul %1, %2, %cst {dimension_numbers = #tpu.dot_dimension_numbers<[1], [0], [0], [1], [0, 0, 1, 1], [], []>} : vector<8x32xf32>, vector<32x32xf32>, vector<8x32xf32> -> vector<8x32xf32>
    %c0_4 = arith.constant 0 : index
    %c0_5 = arith.constant 0 : index
    %4 = vector.load %arg4[%c0_4, %c0_5] : memref<1x32xf32, #tpu.memory_space<vmem>>, vector<1x32xf32>
    %5 = vector.broadcast %4 : vector<1x32xf32> to vector<8x32xf32>
    %6 = arith.addf %3, %5 : vector<8x32xf32>
    %c0_6 = arith.constant 0 : index
    %c0_7 = arith.constant 0 : index
    %c0_8 = arith.constant 0 : index
    %7 = vector.load %arg5[%c0_6, %c0_7, %c0_8] : memref<1x8x32xf32, #tpu.memory_space<vmem>>, vector<1x8x32xf32>
    %8 = vector.shape_cast %7 : vector<1x8x32xf32> to vector<8x32xf32>
    %9 = vector.shape_cast %6 : vector<8x32xf32> to vector<1x8x32xf32>
    tpu.vector_store %arg5[%c0_6, %c0_7, %c0_8], %9 {strides = array<i32>} : memref<1x8x32xf32, #tpu.memory_space<vmem>>, vector<1x8x32xf32>,
    return
  }
  func.func @transform_0(%arg0: i32, %arg1: i32) -> (i32, i32, i32) {
    %c0_i32 = arith.constant 0 : i32
    %c0_i32_0 = arith.constant 0 : i32
    return %arg0, %arg1, %c0_i32 : i32, i32, i32
  }
  func.func @transform_1(%arg0: i32, %arg1: i32) -> (i32, i32) {
    %c0_i32 = arith.constant 0 : i32
    %c0_i32_0 = arith.constant 0 : i32
    %c0_i32_1 = arith.constant 0 : i32
    return %c0_i32, %c0_i32_0 : i32, i32
  }
  func.func @transform_2(%arg0: i32, %arg1: i32) -> (i32, i32) {
    %c0_i32 = arith.constant 0 : i32
    %c0_i32_0 = arith.constant 0 : i32
    %c0_i32_1 = arith.constant 0 : i32
    return %c0_i32, %c0_i32_0 : i32, i32
  }
  func.func @transform_3(%arg0: i32, %arg1: i32) -> (i32, i32, i32) {
    %c0_i32 = arith.constant 0 : i32
    %c0_i32_0 = arith.constant 0 : i32
    return %arg0, %arg1, %c0_i32 : i32, i32, i32
  }
}

</mosaic_0001>

<bundles_post_ra>
// kernel: tpu_custom_call.1
= control target key start
LH: loop header
LB: loop body
LE: loop exit
PB: predicated region body
PF: predicated region fallthrough
CT: control target
= control target key end

     0   :  { %8 = vsyncpa [#allocation3], 0  ;;  %s918_s0 = inlined_call_operand.hbm [shape: f32[2,8,32], index: 0, kind: input, shape index: {}]   ;;  %s919_s1 = inlined_call_operand.hbm [shape: f32[32,32], index: 1, kind: input, shape index: {}]   ;;  %s920_s2 = inlined_call_operand.vmem [shape: f32[1,32], index: 2, kind: input, shape index: {}]   ;;  %s921_s3 = inlined_call_operand.hbm [shape: f32[2,8,32], index: 3, kind: output, shape index: {}]  }
   0x1   :  { %10 = vsyncpa [#allocation3 + $0x1], 0 }
   0x2   :  { %11 = vsyncpa [#allocation6], 0 }
   0x3   :  { %12 = vsyncpa [#allocation4], 0 }
   0x4   :  { %14 = vsyncpa [#allocation4 + $0x1], 0  ;;  %s701_s12 = smov 0   ;;  %s703_s13 = smov 0  }
   0x5   :  { %s705_s14 = smov 0   ;;  %s707_s15 = smov 0  }
   0x6   :  { %s709_s16 = smov 0   ;;  %s711_s17 = smov 0  }
   0x7 LB: > { %s410_s18 = sadd.s32 4294967295, %s671_s17   ;;  %s411_s19 = sadd.s32 4294967294, %s671_s17   ;;  %s671_s17 = sphi %s711_s17, %s20_s17   ;;  %s667_s16 = sphi %s709_s16, %s945_s16   ;;  %s663_s15 = sphi %s707_s15, %s944_s15   ;;  %s659_s14 = sphi %s705_s14, %s943_s14   ;;  %s655_s13 = sphi %s703_s13, %s942_s13   ;;  %s651_s12 = sphi %s701_s12, %s941_s12  }
   0x8   : > { %p54_p0 = scmp.ne.s32.totalorder %s655_s13, %s651_s12  ;;  %p735_p1 = scmp.eq.s32.totalorder %s410_s18, 0 }
   0x9   : > { %p739_p2 = scmp.eq.s32.totalorder %s410_s18, 1  ;;  %p128_p3 = scmp.eq.s32.totalorder %s411_s19, 1 }
   0xa   : > { %s926_s20 = scalar_select %p735_p1, 1, 0 }
   0xb   : > { %s927_s21 = scalar_select %p739_p2, 1, 0 }
   0xc   : > { %p745_p4 = por %p735_p1, %p54_p0  ;;  %p412_p5 = scmp.ge.s32.totalorder %s671_s17, 1 }
   0xd   : > { %p750_p6 = por %p128_p3, %p54_p0  ;;  %p135_p7 = scmp.lt.s32.totalorder %s671_s17, 3 }
   0xe   : > { %s928_s22 = scalar_select %p745_p4, 1, 0 }
   0xf   : > { %s929_s23 = scalar_select %p750_p6, 1, 0 }
  0x10   : > { %p755_p8 = pnand %p412_p5, %p135_p7  ;;  %s673_s25 = smov [#allocation5]  }
  0x11   : > { %s147_s26 = sshll.u32 %s673_s25, 4  ;;  %s32_s28 = sadd.s32 1, %s667_s16  ;;  %s148_s26 = int_to_ptr.vmem [resolvable:$true] %s147_s26 }
  0x12   : > { %s930_s24 = scalar_select %p755_p8, 1, 0 }
  0x13   : > { %p457_p9 = pneg %p755_p8  ;;  %s527_s4 = scalar_lea.hbm %s919_s1, 512 }
  0x14   : > { %p528_p12 = scmp.ne.s32.totalorder %s919_s1, %s527_s4  ;;  %p534_p5 = scmp.lt.u32.totalorder %s527_s4, %s919_s1 }
  0x15   : > { %p764_p11 = pnand %p457_p9, %p735_p1 }
  0x17   : > { %p529_p13 = pneg %p764_p11 }
  0x19   : > { %p530_p0 = pnand %p529_p13, %p528_p12 }
  0x1b   : > { %p531_p3 = pneg %p530_p0 }
  0x1d   : > { %p536_p7 = pnand %p534_p5, %p531_p3 }
  0x1f   : > { %539 = shalt.err (!%p536_p7)
}
  0x20   : > { %s540_s9 = scalar_lea.vmem %s148_s26, 512  ;;  %p548_p1 = scmp.lt.s32.totalorder %s148_s26, %s148_s26 }
  0x21   : > { %p541_p9 = scmp.ne.s32.totalorder %s148_s26, %s540_s9  ;;  %p549_p4 = scmp.lt.s32.totalorder %s540_s9, %s540_s9 }
  0x23   : > { %p543_p10 = pnand %p541_p9, %p529_p13  ;;  %p550_p8 = por %p549_p4, %p548_p1 }
  0x25   : > { %p544_p6 = pneg %p543_p10 }
  0x27   : > { %p551_p2 = pnand %p550_p8, %p544_p6 }
  0x29   : > { %554 = shalt.err (!%p551_p2)
}
  0x2a   : > { %s674_s10 = smov 128   ;;  %s675_s11 = smov 8  }
  0x2b   : > { %460 = dma.hbm_to_vmem [thread:$0]  (!%p764_p11), %s919_s1, 512, %s148_s26, [#allocation6], %s674_s10, %s674_s10, %s675_s11  }
  0x2c   : > { %p34_p1 = scmp.ge.s32.totalorder %s32_s28, 2  ;;  %s41_s25 = sadd.s32 1, %s659_s14 }
  0x2d   : > { %p48_p2 = scmp.ne.s32.totalorder %s659_s14, %s655_s13  ;;  %p49_p4 = scmp.eq.s32.totalorder %s671_s17, 0 }
  0x2e   : > { %s947_s28 = smov (%p34_p1, %s32_s28), 0  ;;  %p933_p8 = scmp.ne.s32.totalorder %s927_s21, 0 }
  0x2f   : > { %p791_p6 = por %p49_p4, %p48_p2  ;;  %s36_s27 = ssub.s32 %s667_s16, %s947_s28 }
  0x30   : > { %p797_p10 = por %p933_p8, %p48_p2  ;;  %p470_p12 = scmp.lt.s32.totalorder %s671_s17, 2 }
  0x31   : > { %p39_p11 = scmp.eq.s32.totalorder %s36_s27, 0  ;;  %s164_s26 = sand.u32 1, %s659_s14  }
  0x32   : > { %s415_s4 = sshll.u32 %s164_s26, 3  ;;  %s416_s6 = sshll.u32 %s667_s16, 7 }
  0x33   : > { %s806_s5 = scalar_select %p39_p11, %s659_s14, %s41_s25  }
  0x34   : > { %s812_s9 = scalar_lea.hbm %s918_s0, %s416_s6  ;;  %s168_s21 = scalar_lea.vmem [#allocation2], %s415_s4 }
  0x35   : > { %s176_s10 = sshll.u32 %s168_s21, 4  ;;  %p818_p13 = pnand %p470_p12, %p791_p6  ;;  %s814_s10 = int_to_ptr.vmem [resolvable:$true] %s176_s10 }
  0x36   : > { %s165_s18 = scalar_lea.sflag [#allocation3], %s164_s26  ;;  %s555_s19 = scalar_lea.hbm %s812_s9, 128 }
  0x37   : > { %p556_p0 = scmp.ne.s32.totalorder %s812_s9, %s555_s19  ;;  %p557_p3 = pneg %p818_p13 }
  0x38   : > { %s560_s4 = scalar_lea.hbm %s918_s0, 256  ;;  %p561_p9 = scmp.lt.u32.totalorder %s812_s9, %s918_s0 }
  0x39   : > { %p558_p5 = pnand %p557_p3, %p556_p0  ;;  %p562_p1 = scmp.lt.u32.totalorder %s560_s4, %s555_s19 }
  0x3a   : > { %p564_p4 = scmp.lt.u32.totalorder %s555_s19, %s812_s9 }
  0x3b   : > { %p559_p7 = pneg %p558_p5  ;;  %p563_p2 = por %p562_p1, %p561_p9 }
  0x3d   : > { %p565_p6 = por %p564_p4, %p563_p2 }
  0x3f   : > { %p566_p8 = pnand %p565_p6, %p559_p7 }
  0x41   : > { %569 = shalt.err (!%p566_p8)
}
  0x42   : > { %s570_s26 = scalar_lea.vmem %s814_s10, 128  ;;  %s676_s7 = smov [#allocation2]  }
  0x43   : > { %p571_p12 = scmp.ne.s32.totalorder %s814_s10, %s570_s26  ;;  %s575_s8 = sshll.u32 %s676_s7, 4  ;;  %s576_s8 = int_to_ptr.vmem [resolvable:$false] %s575_s8 }
  0x44   : > { %s577_s21 = scalar_lea.vmem %s576_s8, 256  ;;  %p578_p5 = scmp.lt.s32.totalorder %s814_s10, %s576_s8 }
  0x45   : > { %p573_p11 = pnand %p571_p12, %p557_p3  ;;  %p579_p9 = scmp.lt.s32.totalorder %s577_s21, %s570_s26 }
  0x47   : > { %p574_p0 = pneg %p573_p11  ;;  %p580_p1 = por %p579_p9, %p578_p5 }
  0x49   : > { %p581_p2 = pnand %p580_p1, %p574_p0 }
  0x4b   : > { %584 = shalt.err (!%p581_p2)
}
  0x4c   : > { %464 = dma.hbm_to_vmem [thread:$0]  (!%p818_p13), %s812_s9, 128, %s814_s10, %s165_s18  }
  0x4d   : > { %p936_p7 = scmp.ne.s32.totalorder %s930_s24, 0 }
  0x4e   : > { %s850_s19 = sand.u32 (!%p936_p7), 1, %s655_s13   ;;  %p937_p3 = scmp.ne.s32.totalorder (!%p936_p7), %s928_s22, 0 }
  0x4f   : > { %185 = sbr.rel (%p936_p7) target bundleno = 329 (0x149), region = 32  ;;  %s418_s25 = sshll.u32 (!%p936_p7), %s850_s19, 3 }
  0x50   : > { %s188_s27 = scalar_lea.sflag (!%p936_p7), [#allocation3], %s850_s19  ;;  %s191_s4 = scalar_lea.vmem (!%p936_p7), [#allocation2], %s418_s25 }
  0x56   : > { %638 = dma.done.wait (%p937_p3), %s188_s27, 128  }
  0x57   : > { %640 = vsyncadd (%p937_p3), %s188_s27, 4294967168  ;;  %p938_p4 = scmp.ne.s32.totalorder %s926_s20, 0 }
  0x59   : > { %642 = dma.done.wait (%p938_p4), [#allocation6], 512  }
  0x5a   : > { %644 = vsyncadd (%p938_p4), [#allocation6], 4294966784  ;;  %v677_v0 = vmov 0.0|0.0   ;;  %vm678_vm0 = vmmov 0   ;;  %v679_v1 = vmov 0.0   ;;  %v219_v2 = vld [vmem:[#allocation5] sm:$0xff] }
  0x5b   : > { %443 = vmatprep.subr.bf16.mxu0 %v677_v0  ;;  %440 = vmatprep.mubr.msk.f32.mxu0 %vm678_vm0, %v679_v1  ;;  %v220_v3 = vld [vmem:[#allocation5 + $0x8] sm:$0xff]  ;;  %v221_v4 = vld [vmem:[#allocation5 + $0x10] sm:$0xff]  ;;  %v222_v6 = vld [vmem:[#allocation5 + $0x18] sm:$0xff]  ;;  %vm230_vm1 = vcmask 261120   ;;  %s424_s24 = sshll.u32 %s663_s15, 7  ;;  %s217_s9 = scalar_lea.vmem [#allocation7], %s418_s25 }
  0x5c   : > { %v444_v5 = vpack.c.bf16 %v220_v3, %v219_v2  ;;  %v447_v7 = vpack.c.bf16 %v222_v6, %v221_v4  ;;  %v218_v8 = vld [vmem:[%s191_s4] sm:$0xff]  ;;  %s320_s10 = sshll.u32 %s217_s9, 4  ;;  %s869_s29 = scalar_lea.hbm %s921_s3, %s424_s24  ;;  %s871_s10 = int_to_ptr.vmem [resolvable:$true] %s320_s10 }
  0x5d   : > { %v421_v9 = vld [vmem:[%s920_s2] ss:$0 sm:$0xff]  ;;  %s306_s6 = scalar_lea.sflag [#allocation4], %s850_s19  ;;  %s585_s26 = scalar_lea.vmem %s871_s10, 128 }
  0x5e   : > { %445 = vmatpush3.bf16.msra.mxu0 %v444_v5  ;;  %p586_p13 = scmp.ne.s32.totalorder %s871_s10, %s585_s26  ;;  %s680_s15 = smov [#allocation7]  }
  0x5f   : > { %446 = vmatprep.subr.bf16.mxu0 %v677_v0  ;;  %s589_s7 = sshll.u32 %s680_s15, 4  ;;  %s590_s7 = int_to_ptr.vmem [resolvable:$false] %s589_s7 }
  0x60   : > { %p587_p6 = pnand %p586_p13, %p797_p10  ;;  %s591_s8 = scalar_lea.vmem %s590_s7, 256 }
  0x61   : > { %p592_p12 = scmp.lt.s32.totalorder %s871_s10, %s590_s7  ;;  %p593_p11 = scmp.lt.s32.totalorder %s591_s8, %s585_s26 }
  0x62   : > { %448 = vmatpush3.bf16.msra.mxu0 %v447_v7  ;;  %p588_p8 = pneg %p587_p6 }
  0x63   : > { %p594_p0 = por %p593_p11, %p592_p12 }
  0x65   : > { %441 = vmatmul.mubr.msk.f32.vlgmr.msra.gmra.mrb[0].mxu0 %vm230_vm1, %v218_v8  ;;  %p595_p5 = pnand %p594_p0, %p588_p8 }
 0x138   : > { %v300_v10 = vpop.f32.mrb[0].mxu0 }
 0x139   : > { %v301_v11 = vadd.f32 %v421_v9, %v300_v10  ;;  %v442_v12 = vpop.f32.mrb[1].mxu0 }
 0x13b   : > { %304 = vst.msk [vmem:[%s217_s9] sm:$0xff] %vm230_vm1, %v301_v11 }
 0x13c   : > { %598 = shalt.err (!%p595_p5)
}
 0x13d   : > { %s599_s21 = scalar_lea.hbm %s869_s29, 128  ;;  %s603_s27 = scalar_lea.hbm %s921_s3, 256 }
 0x13e   : > { %p600_p9 = scmp.ne.s32.totalorder %s869_s29, %s599_s21  ;;  %p604_p7 = scmp.lt.u32.totalorder %s869_s29, %s921_s3 }
 0x13f   : > { %p605_p3 = scmp.lt.u32.totalorder %s603_s27, %s599_s21  ;;  %p607_p13 = scmp.lt.u32.totalorder %s599_s21, %s869_s29 }
 0x140   : > { %p601_p1 = pnand %p600_p9, %p797_p10 }
 0x141   : > { %p606_p4 = por %p605_p3, %p604_p7 }
 0x142   : > { %p602_p2 = pneg %p601_p1 }
 0x143   : > { %p608_p6 = por %p607_p13, %p606_p4 }
 0x145   : > { %p609_p8 = pnand %p608_p6, %p602_p2 }
 0x147   : > { %612 = shalt.err (!%p609_p8)
}
 0x148   : > { %455 = dma.vmem_to_hbm [thread:$0]  (%p797_p10), %s871_s10, 128, %s869_s29, %s306_s6  }
 0x149 PF: > { %s332_s22 = sand.u32 1, %s651_s12   ;;  %p939_p12 = scmp.ne.s32.totalorder %s929_s23, 0 }
 0x14a   : > { %p940_p11 = scmp.ge.s32.totalorder %s671_s17, 2  ;;  %s333_s24 = scalar_lea.sflag [#allocation4], %s332_s22 }
 0x14c   : > { %p466_p0 = pnand %p940_p11, %p939_p12 }
 0x14e   : > { %646 = dma.done.wait (!%p466_p0), %s333_s24, 128  }
 0x14f   : > { %648 = vsyncadd (!%p466_p0), %s333_s24, 4294967168  ;;  %s20_s17 = sadd.s32 1, %s671_s17   ;;  %s941_s12 = smov %s655_s13 }
 0x150   : > { %p17_p5 = scmp.ge.s32.totalorder %s20_s17, 4   ;;  %s942_s13 = smov %s659_s14 }
 0x151   : > { %s943_s14 = smov %s806_s5  ;;  %s944_s15 = smov %s667_s16 }
 0x152   : > { %s945_s16 = smov %s947_s28  ;;  %19 = sbr.rel (!%p17_p5) target bundleno = 7 (0x7), region = 81 }
 0x159   :  { %338 = vsyncpa [#allocation3], 1 }
 0x15a   :  { %340 = vsyncpa [#allocation3 + $0x1], 1 }
 0x15b   :  { %341 = vsyncpa [#allocation6], 1 }
 0x15c   :  { %342 = vsyncpa [#allocation4], 1 }
 0x15d   :  { %344 = vsyncpa [#allocation4 + $0x1], 1 }

</bundles_post_ra>
